<compile_context>
chip_gen: v7x
topology: tpu7x:2x2x1
jax: 0.10.0
libtpu: 0.0.40
codegen_flags: <defaults>
</compile_context>

<pallas_src>
import jax
import jax.numpy as jnp
from jax.experimental import pallas as pl
from jax.experimental.pallas import tpu as pltpu


def _bus_embedding_kernel(x_ref, w_ref, out_ref):
    # x_ref : (block_rows, 9*P)   masked per-row groups, packed P rows / lane row
    # w_ref : (9*P, P*d_pad)      block-diagonal stacked [w_t; b_t] matrix
    # out   : (block_rows, P*d_pad)
    z = jnp.dot(
        x_ref[...], w_ref[...],
        precision=jax.lax.Precision.HIGHEST,      # exactness required: this is the real Linear
        preferred_element_type=jnp.float32,
    )
    out_ref[...] = jnp.tanh(z).astype(out_ref.dtype)


def _lane_friendly_width(d):
    """Pad d to a divisor of 128 (d<128) or a multiple of 128 (d>=128)."""
    if d >= 128:
        d_pad = -(-d // 128) * 128
        return d_pad, 1
    d_pad = 1
    while d_pad < d:
        d_pad *= 2                 # divisors of 128 are powers of two
    return d_pad, 128 // d_pad


def bus_embedding(feat, bus_type, params, *,
                  target_tile_bytes=2 * 1024 * 1024,
                  out_dtype=jnp.float32):
    """feat: (N, 2) f32; bus_type: (N,) int; params: W (2, d) / b (1, d) per type.

    Returns (N, d) in `out_dtype` (float32 by default; bf16 supported if the
    consumer accepts it -- halves the dominant HBM write).
    """
    f32 = jnp.float32
    N = feat.shape[0]
    d = params["w_slack"].shape[1]

    d_pad, P = _lane_friendly_width(d)
    D = P * d_pad                   # packed (lane-dense) output width
    K = 9 * P                       # packed contraction width
    unit = 8 * P                    # logical-row tile granularity (8-sublane mult.)

    # ---- tile sizing: ~target_tile_bytes of output per grid step -------------
    target_rows = max(unit, target_tile_bytes // (4 * d_pad))
    tile_n = -(-target_rows // unit) * unit
    steps = max(1, -(-N // tile_n))
    if steps == 1 and N > unit:
        steps = 2                   # give both v7x TensorCores something to do
    if steps > 1 and steps % 2 == 1:
        steps += 1                  # even step count -> balanced across 2 TCs
    rows_per_step = -(-N // steps)
    tile_n = -(-rows_per_step // unit) * unit
    n_pad = steps * tile_n
    pad = n_pad - N

    n_packed = n_pad // P
    block_rows = tile_n // P        # packed rows per grid step (multiple of 8)

    # ---- wrapper-side masked-group construction (cheap XLA elementwise) ------
    feat = feat.astype(f32)
    bt = bus_type.astype(jnp.int32)
    trip = jnp.concatenate([feat, jnp.ones((N, 1), f32)], axis=1)        # (N, 3) = [f0, f1, 1]
    groups = [trip * (bt == t).astype(f32)[:, None] for t in (1, 2, 3)]  # masked per type
    x9 = jnp.concatenate(groups, axis=1)                                 # (N, 9)
    x9 = jnp.pad(x9, ((0, pad), (0, 0)))                                 # padded rows -> all-zero
    x_packed = x9.reshape(n_packed, K)   # packed row i, cols k*9:(k+1)*9 = logical row i*P+k

    # ---- stacked + block-diagonal weight matrix ------------------------------
    def padw(a):                     # (r, d) -> (r, d_pad), zero columns are inert
        return jnp.pad(a.astype(f32), ((0, 0), (0, d_pad - d)))

    S = jnp.concatenate([padw(params["w_slack"]), padw(params["b_slack"]),
                         padw(params["w_gen"]),   padw(params["b_gen"]),
                         padw(params["w_load"]),  padw(params["b_load"])],
                        axis=0)                                          # (9, d_pad)
    w_big = jnp.kron(jnp.eye(P, dtype=f32), S)                           # (9P, P*d_pad)

    out_packed = pl.pallas_call(
        _bus_embedding_kernel,
        out_shape=jax.ShapeDtypeStruct((n_packed, D), out_dtype),
        grid_spec=pltpu.PrefetchScalarGridSpec(
            num_scalar_prefetch=0,
            grid=(steps,),
            in_specs=[
                pl.BlockSpec((block_rows, K), lambda i: (i, 0)),   # packed row groups
                pl.BlockSpec((K, D), lambda i: (0, 0)),            # VMEM-resident weights
            ],
            out_specs=pl.BlockSpec((block_rows, D), lambda i: (i, 0)),
        ),
        compiler_params=pltpu.CompilerParams(
            dimension_semantics=("parallel",),
            # ~2 MiB out tile * 2 (dbl-buffer) + ~1 out-sized intermediate +
            # small input/constant tiles  <<  32 MiB on every generation
            # (v5e/v6e 128 MiB, v7x 64 MiB physical).
            vmem_limit_bytes=32 * 1024 * 1024,
        ),
    )(x_packed, w_big)

    # Packed row i, lanes k*d_pad:(k+1)*d_pad == logical row i*P + k.
    return out_packed.reshape(n_pad, d_pad)[:N, :d]


def init_params(key, d):
    """Deterministic synthetic params. Linear(2, d): stored transposed as (2, d)/(1, d)."""
    ks = jax.random.split(key, 6)
    bound = 1.0 / jnp.sqrt(2.0)     # PyTorch default uniform bound for in_features=2

    def w(k):
        return jax.random.uniform(k, (2, d), jnp.float32, -bound, bound)

    def b(k):
        return jax.random.uniform(k, (1, d), jnp.float32, -bound, bound)

    return {
        "w_slack": w(ks[0]), "b_slack": b(ks[1]),
        "w_gen":   w(ks[2]), "b_gen":   b(ks[3]),
        "w_load":  w(ks[4]), "b_load":  b(ks[5]),
    }


def reference(feat, bus_type, params):
    """Pure-JAX reference mirroring the PyTorch forward (f32 math)."""
    hi = jax.lax.Precision.HIGHEST

    def branch(w, b):
        return jnp.tanh(jnp.dot(feat, w, precision=hi) + b)

    y1 = branch(params["w_slack"], params["b_slack"])
    y2 = branch(params["w_gen"], params["b_gen"])
    y3 = branch(params["w_load"], params["b_load"])
    bt = bus_type[:, None]
    return jnp.where(bt == 1, y1,
           jnp.where(bt == 2, y2,
           jnp.where(bt == 3, y3, jnp.zeros_like(y1))))


def _check(key, N, d):
    k_feat, k_type, k_params = jax.random.split(key, 3)
    feat = jax.random.normal(k_feat, (N, 2), jnp.float32)
    # include an out-of-range type (0) to exercise the "stays zero" path
    bus_type = jax.random.randint(k_type, (N,), 0, 4, jnp.int32)
    params = init_params(k_params, d)

    out = jax.block_until_ready(bus_embedding(feat, bus_type, params))
    ref = reference(feat, bus_type, params)
    assert out.shape == (N, d)
    assert jnp.allclose(out, ref, atol=1e-5, rtol=1e-5), f"mismatch vs reference (N={N}, d={d})"


if __name__ == "__main__":
    key = jax.random.PRNGKey(0)
    k0, k1, k2 = jax.random.split(key, 3)

    _check(k0, N=64, d=32)    # lane-packed path (P=4), no padding
    _check(k1, N=50, d=24)    # d padded to 32 + row padding
    _check(k2, N=40, d=160)   # d >= 128 path (P=1, padded to 256)

    print("KERNEL_OK")
</pallas_src>

<mosaic_0001>
module attributes {stable_mosaic.version = 11 : i64} {
  func.func @_bus_embedding_kernel(%arg0: i32, %arg1: memref<8x36xf32, #tpu.memory_space<vmem>>, %arg2: memref<36x128xf32, #tpu.memory_space<vmem>>, %arg3: memref<8x128xf32, #tpu.memory_space<vmem>>) attributes {dimension_semantics = [#tpu.dimension_semantics<parallel>], iteration_bounds = array<i64: 2>, scalar_prefetch = 0 : i64, scratch_operands = 0 : i64, tpu.core_type = #tpu.core_type<tc>, window_params = [{transform_indices = @transform_0, window_bounds = array<i64: 8, 36>}, {pipeline_mode = #tpu.pipeline_mode<synchronous>, transform_indices = @transform_1, window_bounds = array<i64: 36, 128>}, {transform_indices = @transform_2, window_bounds = array<i64: 8, 128>}]} {
    %c0 = arith.constant 0 : index
    %c0_0 = arith.constant 0 : index
    %0 = vector.load %arg1[%c0, %c0_0] : memref<8x36xf32, #tpu.memory_space<vmem>>, vector<8x36xf32>
    %c0_1 = arith.constant 0 : index
    %c0_2 = arith.constant 0 : index
    %1 = vector.load %arg2[%c0_1, %c0_2] : memref<36x128xf32, #tpu.memory_space<vmem>>, vector<36x128xf32>
    %cst = arith.constant dense<0.000000e+00> : vector<8x128xf32>
    %2 = tpu.matmul %0, %1, %cst {dimension_numbers = #tpu.dot_dimension_numbers<[1], [0], [0], [1], [0, 0, 1, 1], [], []>, precision = #tpu.contract_precision<fp32>} : vector<8x36xf32>, vector<36x128xf32>, vector<8x128xf32> -> vector<8x128xf32>
    %3 = math.tanh %2 : vector<8x128xf32>
    %c0_3 = arith.constant 0 : index
    %c0_4 = arith.constant 0 : index
    %4 = vector.load %arg3[%c0_3, %c0_4] : memref<8x128xf32, #tpu.memory_space<vmem>>, vector<8x128xf32>
    tpu.vector_store %arg3[%c0_3, %c0_4], %3 {strides = array<i32>} : memref<8x128xf32, #tpu.memory_space<vmem>>, vector<8x128xf32>,
    return
  }
  func.func @transform_0(%arg0: i32) -> (i32, i32) {
    %c0_i32 = arith.constant 0 : i32
    %c0_i32_0 = arith.constant 0 : i32
    return %arg0, %c0_i32 : i32, i32
  }
  func.func @transform_1(%arg0: i32) -> (i32, i32) {
    %c0_i32 = arith.constant 0 : i32
    %c0_i32_0 = arith.constant 0 : i32
    %c0_i32_1 = arith.constant 0 : i32
    return %c0_i32, %c0_i32_0 : i32, i32
  }
  func.func @transform_2(%arg0: i32) -> (i32, i32) {
    %c0_i32 = arith.constant 0 : i32
    %c0_i32_0 = arith.constant 0 : i32
    return %arg0, %c0_i32 : i32, i32
  }
}

</mosaic_0001>

<bundles_post_ra>
// kernel: tpu_custom_call.1
= control target key start
LH: loop header
LB: loop body
LE: loop exit
PB: predicated region body
PF: predicated region fallthrough
CT: control target
= control target key end

     0   :  { %7 = vsyncpa [#allocation3], 0  ;;  %s1433_s0 = inlined_call_operand.hbm [shape: f32[16,36], index: 0, kind: input, shape index: {}]   ;;  %s1434_s1 = inlined_call_operand.hbm [shape: f32[36,128], index: 1, kind: input, shape index: {}]   ;;  %s1435_s2 = inlined_call_operand.hbm [shape: f32[16,128], index: 2, kind: output, shape index: {}]  }
   0x1   :  { %9 = vsyncpa [#allocation3 + $0x1], 0 }
   0x2   :  { %10 = vsyncpa [#allocation6], 0 }
   0x3   :  { %11 = vsyncpa [#allocation4], 0 }
   0x4   :  { %13 = vsyncpa [#allocation4 + $0x1], 0  ;;  %s1172_s9 = smov 0   ;;  %s1174_s10 = smov 0  }
   0x5   :  { %s1176_s11 = smov 0   ;;  %s1178_s12 = smov 0  }
   0x6 LB: > { %s1193_s13 = sadd.s32 4294967295, %s1147_s12   ;;  %s782_s14 = sadd.s32 4294967294, %s1147_s12   ;;  %s1147_s12 = sphi %s1178_s12, %s1455_s12   ;;  %s1143_s11 = sphi %s1176_s11, %s1454_s11   ;;  %s1139_s10 = sphi %s1174_s10, %s1453_s10   ;;  %s1135_s9 = sphi %s1172_s9, %s1452_s9  }
   0x7   : > { %p39_p0 = scmp.ne.s32.totalorder %s1139_s10, %s1135_s9  ;;  %p1436_p1 = scmp.eq.s32.totalorder %s1193_s13, 0 }
   0x8   : > { %p90_p3 = scmp.eq.s32.totalorder %s782_s14, 1  ;;  %p783_p5 = scmp.ge.s32.totalorder %s1147_s12, 1 }
   0x9   : > { %p1202_p4 = por %p1436_p1, %p39_p0  ;;  %p97_p7 = scmp.lt.s32.totalorder %s1147_s12, 3 }
   0xa   : > { %p1207_p6 = por %p90_p3, %p39_p0  ;;  %s1149_s18 = smov [#allocation5]  }
   0xb   : > { %s1439_s15 = scalar_select %p1202_p4, 1, 0 }
   0xc   : > { %s1440_s16 = scalar_select %p1207_p6, 1, 0 }
   0xd   : > { %p1212_p8 = pnand %p783_p5, %p97_p7  ;;  %s109_s19 = sshll.u32 %s1149_s18, 4  ;;  %s1216_s19 = int_to_ptr.vmem [resolvable:$true] %s109_s19 }
   0xe   : > { %s1228_s21 = sadd.s32 1, %s1147_s12   ;;  %s26_s22 = sadd.s32 1, %s1143_s11 }
   0xf   : > { %s1441_s17 = scalar_select %p1212_p8, 1, 0 }
  0x10   : > { %p963_p9 = pneg %p1212_p8  ;;  %s23_s23 = ssub.s32 %s1147_s12, %s1228_s21 }
  0x11   : > { %s1019_s26 = scalar_lea.hbm %s1434_s1, 640 }
  0x12   : > { %p1223_p11 = pnand %p963_p9, %p1436_p1  ;;  %p1020_p12 = scmp.ne.s32.totalorder %s1434_s1, %s1019_s26 }
  0x13   : > { %p1026_p5 = scmp.lt.u32.totalorder %s1019_s26, %s1434_s1 }
  0x14   : > { %p1021_p13 = pneg %p1223_p11 }
  0x16   : > { %p1022_p0 = pnand %p1021_p13, %p1020_p12 }
  0x18   : > { %p1023_p3 = pneg %p1022_p0 }
  0x1a   : > { %p1028_p7 = pnand %p1026_p5, %p1023_p3 }
  0x1c   : > { %1031 = shalt.err (!%p1028_p7)
}
  0x1d   : > { %s1032_s3 = scalar_lea.vmem %s1216_s19, 640  ;;  %p1040_p2 = scmp.lt.s32.totalorder %s1216_s19, %s1216_s19 }
  0x1e   : > { %p1033_p9 = scmp.ne.s32.totalorder %s1216_s19, %s1032_s3  ;;  %p1041_p6 = scmp.lt.s32.totalorder %s1032_s3, %s1032_s3 }
  0x20   : > { %p1035_p10 = pnand %p1033_p9, %p1021_p13  ;;  %p1042_p4 = por %p1041_p6, %p1040_p2 }
  0x22   : > { %p1036_p1 = pneg %p1035_p10 }
  0x24   : > { %p1043_p8 = pnand %p1042_p4, %p1036_p1 }
  0x26   : > { %1046 = shalt.err (!%p1043_p8)
}
  0x27   : > { %s1150_s4 = smov 128   ;;  %s1151_s5 = smov 8  }
  0x28   : > { %966 = dma.hbm_to_vmem [thread:$0]  (!%p1223_p11), %s1434_s1, 640, %s1216_s19, [#allocation6], %s1150_s4, %s1150_s4, %s1151_s5  }
  0x29   : > { %p24_p2 = scmp.eq.s32.totalorder %s23_s23, 0  ;;  %p33_p1 = scmp.ne.s32.totalorder %s1143_s11, %s1139_s10 }
  0x2a   : > { %p34_p4 = scmp.eq.s32.totalorder %s1147_s12, 0  ;;  %p976_p6 = scmp.lt.s32.totalorder %s1147_s12, 2 }
  0x2b   : > { %s1259_s8 = scalar_select %p24_p2, %s1143_s11, %s26_s22  }
  0x2c   : > { %p35_p8 = por %p34_p4, %p33_p1  ;;  %p1443_p10 = scmp.eq.s32.totalorder %s1193_s13, 1 }
  0x2d   : > { %s123_s18 = sand.u32 1, %s1143_s11   ;;  %s787_s24 = sshll.u32 %s1147_s12, 7 }
  0x2e   : > { %p1263_p12 = por %p1443_p10, %p33_p1  ;;  %s786_s25 = sshll.u32 %s123_s18, 3 }
  0x2f   : > { %s1272_s27 = scalar_lea.hbm %s1433_s0, %s787_s24  ;;  %s127_s19 = scalar_lea.vmem [#allocation2], %s786_s25 }
  0x30   : > { %s134_s22 = sshll.u32 %s127_s19, 4  ;;  %p1274_p11 = pnand %p976_p6, %p35_p8  ;;  %s1278_s22 = int_to_ptr.vmem [resolvable:$true] %s134_s22 }
  0x31   : > { %s124_s28 = scalar_lea.sflag [#allocation3], %s123_s18  ;;  %s1047_s29 = scalar_lea.hbm %s1272_s27, 128 }
  0x32   : > { %p1048_p13 = scmp.ne.s32.totalorder %s1272_s27, %s1047_s29  ;;  %p1049_p0 = pneg %p1274_p11 }
  0x33   : > { %s1052_s4 = scalar_lea.hbm %s1433_s0, 256  ;;  %p1053_p7 = scmp.lt.u32.totalorder %s1272_s27, %s1433_s0 }
  0x34   : > { %p1050_p3 = pnand %p1049_p0, %p1048_p13  ;;  %p1054_p9 = scmp.lt.u32.totalorder %s1052_s4, %s1047_s29 }
  0x35   : > { %p1056_p1 = scmp.lt.u32.totalorder %s1047_s29, %s1272_s27 }
  0x36   : > { %p1051_p5 = pneg %p1050_p3  ;;  %p1055_p2 = por %p1054_p9, %p1053_p7 }
  0x38   : > { %p1057_p4 = por %p1056_p1, %p1055_p2 }
  0x3a   : > { %p1058_p6 = pnand %p1057_p4, %p1051_p5 }
  0x3c   : > { %1061 = shalt.err (!%p1058_p6)
}
  0x3d   : > { %s1062_s7 = scalar_lea.vmem %s1278_s22, 128  ;;  %s1152_s18 = smov [#allocation2]  }
  0x3e   : > { %p1063_p8 = scmp.ne.s32.totalorder %s1278_s22, %s1062_s7  ;;  %s1067_s24 = sshll.u32 %s1152_s18, 4  ;;  %s1068_s24 = int_to_ptr.vmem [resolvable:$false] %s1067_s24 }
  0x3f   : > { %s1069_s25 = scalar_lea.vmem %s1068_s24, 256  ;;  %p1070_p3 = scmp.lt.s32.totalorder %s1278_s22, %s1068_s24 }
  0x40   : > { %p1065_p10 = pnand %p1063_p8, %p1049_p0  ;;  %p1071_p7 = scmp.lt.s32.totalorder %s1069_s25, %s1062_s7 }
  0x42   : > { %p1066_p13 = pneg %p1065_p10  ;;  %p1072_p9 = por %p1071_p7, %p1070_p3 }
  0x44   : > { %p1073_p2 = pnand %p1072_p9, %p1066_p13 }
  0x46   : > { %1076 = shalt.err (!%p1073_p2)
}
  0x47   : > { %970 = dma.hbm_to_vmem [thread:$0]  (!%p1274_p11), %s1272_s27, 128, %s1278_s22, %s124_s28  }
  0x48   : > { %p1446_p5 = scmp.ne.s32.totalorder %s1441_s17, 0 }
  0x49   : > { %s1308_s20 = sand.u32 (!%p1446_p5), 1, %s1139_s10   ;;  %p1447_p0 = scmp.ne.s32.totalorder (!%p1446_p5), %s1439_s15, 0 }
  0x4a   : > { %143 = sbr.rel (%p1446_p5) target bundleno = 360 (0x168), region = 28  ;;  %s789_s26 = sshll.u32 (!%p1446_p5), %s1308_s20, 3 }
  0x4b   : > { %s146_s19 = scalar_lea.sflag (!%p1446_p5), [#allocation3], %s1308_s20  ;;  %s149_s29 = scalar_lea.vmem (!%p1446_p5), [#allocation2], %s789_s26 }
  0x51   : > { %1122 = dma.done.wait (%p1447_p0), %s146_s19, 128  }
  0x52   : > { %1124 = vsyncadd (%p1447_p0), %s146_s19, 4294967168  ;;  %p1448_p11 = scmp.eq.s32.totalorder %s1193_s13, 0 }
  0x54   : > { %1126 = dma.done.wait (%p1448_p11), [#allocation6], 640   ;;  %p1449_p1 = pmov %p1448_p11 }
  0x55   : > { %v1153_v0 = vmov 0.0|0.0   ;;  %vm1154_vm0 = vmmov 0   ;;  %v1155_v1 = vmov 0.0   ;;  %vm184_vm1 = vcmask 1043456   ;;  %v175_v2 = vld [vmem:[#allocation5] sm:$0xff]  ;;  %v176_v3 = vld [vmem:[#allocation5 + $0x8] sm:$0xff] }
  0x56   : > { %1128 = vsyncadd (%p1449_p1), [#allocation6], 4294966656  ;;  %910 = vmatprep.subr.bf16.mxu1 %v1153_v0  ;;  %928 = vmatprep.subr.bf16.mxu0 %v1153_v0  ;;  %v177_v4 = vld [vmem:[#allocation5 + $0x10] sm:$0xff]  ;;  %vm180_vm2 = vcmask 293888   ;;  %v189_v5 = vand.u32 4294901760, %v175_v2  ;;  %v192_v6 = vand.u32 4294901760, %v176_v3 }
  0x57   : > { %842 = vmatprep.mubr.msk.f32.mxu1 %vm1154_vm0, %v1155_v1  ;;  %881 = vmatprep.mubr.msk.f32.mxu0 %vm1154_vm0, %v1155_v1  ;;  %v178_v7 = vld [vmem:[#allocation5 + $0x18] sm:$0xff]  ;;  %v195_v8 = vand.u32 4294901760, %v177_v4  ;;  %v179_v9 = vld [vmem:[#allocation5 + $0x20] sm:$0xf]  ;;  %s793_s15 = sshll.u32 %s1193_s13, 7  ;;  %s173_s17 = scalar_lea.vmem [#allocation7], %s789_s26 }
  0x58   : > { %v198_v10 = vand.u32 4294901760, %v178_v7  ;;  %v186_v11 = vsel %vm184_vm1, %v179_v9, 0  ;;  %v174_v12 = vld [vmem:[%s149_s29] sm:$0xff]  ;;  %v1328_v13 = vpack.c.bf16 %v192_v6, %v189_v5  ;;  %v1330_v14 = vsub.f32 %v175_v2, %v189_v5  ;;  %s702_s27 = sshll.u32 %s173_s17, 4  ;;  %s1389_s28 = scalar_lea.hbm %s1435_s2, %s793_s15  ;;  %s1391_s27 = int_to_ptr.vmem [resolvable:$true] %s702_s27 }
  0x59   : > { %v277_v15 = vsub.f32 %v176_v3, %v192_v6  ;;  %v1332_v16 = vsub.f32 %v177_v4, %v195_v8  ;;  %v182_v19 = vsel %vm180_vm2, %v174_v12, 0  ;;  %v201_v24 = vand.u32 4294901760, %v186_v11  ;;  %s689_s30 = scalar_lea.sflag [#allocation4], %s1308_s20  ;;  %s1077_s3 = scalar_lea.vmem %s1391_s27, 128 }
  0x5a   : > { %v1334_v17 = vpack.c.bf16 %v198_v10, %v195_v8  ;;  %v1336_v18 = vsub.f32 %v178_v7, %v198_v10  ;;  %912 = vmatpush3.bf16.msra.mxu1 %v1328_v13  ;;  %930 = vmatpush3.bf16.msra.mxu0 %v1328_v13  ;;  %v1340_v20 = vand.u32 4294901760, %v182_v19  ;;  %v271_v21 = vand.u32 4294901760, %v1330_v14  ;;  %p1078_p4 = scmp.ne.s32.totalorder %s1391_s27, %s1077_s3  ;;  %s1156_s13 = smov [#allocation7]  }
  0x5b   : > { %v278_v22 = vand.u32 4294901760, %v277_v15  ;;  %v285_v23 = vand.u32 4294901760, %v1332_v16  ;;  %913 = vmatprep.subr.bf16.mxu1 %v1153_v0  ;;  %931 = vmatprep.subr.bf16.mxu0 %v1153_v0  ;;  %v298_v29 = vsub.f32 %v186_v11, %v201_v24  ;;  %v923_v46 = vpack.c.bf16 %v277_v15, %v1330_v14  ;;  %s1081_s4 = sshll.u32 %s1156_s13, 4  ;;  %s1082_s4 = int_to_ptr.vmem [resolvable:$false] %s1081_s4 }
  0x5c   : > { %v292_v25 = vand.u32 4294901760, %v1336_v18  ;;  %v259_v26 = vsub.f32 %v182_v19, %v1340_v20  ;;  %v272_v27 = vsub.f32 %v1330_v14, %v271_v21  ;;  %v926_v47 = vpack.c.bf16 %v1336_v18, %v1332_v16  ;;  %p1079_p6 = pnand %p1078_p4, %p1263_p12  ;;  %s1083_s5 = scalar_lea.vmem %s1082_s4, 256 }
  0x5d   : > { %v279_v28 = vsub.f32 %v277_v15, %v278_v22  ;;  %v286_v30 = vsub.f32 %v1332_v16, %v285_v23  ;;  %v935_v36 = vpack.c.bf16 %v278_v22, %v271_v21  ;;  %v299_v40 = vand.u32 4294901760, %v298_v29  ;;  %p1084_p10 = scmp.lt.s32.totalorder %s1391_s27, %s1082_s4  ;;  %p1085_p13 = scmp.lt.s32.totalorder %s1083_s5, %s1077_s3 }
  0x5e   : > { %v293_v31 = vsub.f32 %v1336_v18, %v292_v25  ;;  %915 = vmatpush3.bf16.msra.mxu1 %v1334_v17  ;;  %933 = vmatpush3.bf16.msra.mxu0 %v1334_v17  ;;  %v260_v32 = vand.u32 4294901760, %v259_v26  ;;  %v273_v33 = vand.u32 4294901760, %v272_v27  ;;  %v938_v43 = vpack.c.bf16 %v292_v25, %v285_v23  ;;  %p1080_p8 = pneg %p1079_p6 }
  0x5f   : > { %v280_v34 = vand.u32 4294901760, %v279_v28  ;;  %840 = vmatprep.subr.mxu1 %v1155_v1  ;;  %879 = vmatprep.subr.mxu0 %v1155_v1  ;;  %v287_v38 = vand.u32 4294901760, %v286_v30  ;;  %v300_v44 = vsub.f32 %v298_v29, %v299_v40  ;;  %p1086_p3 = por %p1085_p13, %p1084_p10 }
  0x60   : > { %v261_v35 = vsub.f32 %v259_v26, %v260_v32  ;;  %v294_v39 = vand.u32 4294901760, %v293_v31 }
  0x61   : > { %v917_v37 = vpack.c.bf16 %v280_v34, %v273_v33  ;;  %v301_v45 = vand.u32 4294901760, %v300_v44  ;;  %p1087_p7 = pnand %p1086_p3, %p1080_p8 }
  0x62   : > { %841 = vmatpush3.msra.mxu1 %v201_v24  ;;  %880 = vmatpush3.msra.mxu0 %v201_v24  ;;  %v262_v41 = vand.u32 4294901760, %v261_v35  ;;  %v920_v42 = vpack.c.bf16 %v294_v39, %v287_v38 }
  0x63   : > { %916 = vmatprep.subr.bf16.mxu1 %v1153_v0  ;;  %934 = vmatprep.subr.bf16.mxu0 %v1153_v0 }
  0x64   : > { %843 = vmatmul.mubr.f32.vlgmr.msra.gmra.mrb[0].mxu1 %v262_v41  ;;  %882 = vmatmul.mubr.f32.vlgmr.msra.gmra.mrb[0].mxu0 %v260_v32 }
  0x65   : > { %918 = vmatpush3.bf16.msra.mxu1 %v917_v37  ;;  %936 = vmatpush3.bf16.msra.mxu0 %v935_v36 }
  0x66   : > { %919 = vmatprep.subr.bf16.mxu1 %v1153_v0  ;;  %937 = vmatprep.subr.bf16.mxu0 %v1153_v0 }
  0x67   : > { %855 = vmatprep.mubr.msk.f32.mxu1 %vm1154_vm0, %v1155_v1  ;;  %894 = vmatprep.mubr.msk.f32.mxu0 %vm1154_vm0, %v1155_v1 }
  0x69   : > { %921 = vmatpush3.bf16.msra.mxu1 %v920_v42  ;;  %939 = vmatpush3.bf16.msra.mxu0 %v938_v43 }
  0x6a   : > { %853 = vmatprep.subr.mxu1 %v1155_v1  ;;  %892 = vmatprep.subr.mxu0 %v1155_v1 }
  0x6d   : > { %854 = vmatpush3.msra.mxu1 %v301_v45  ;;  %893 = vmatpush3.msra.mxu0 %v299_v40 }
  0x6e   : > { %922 = vmatprep.subr.bf16.mxu1 %v1153_v0  ;;  %940 = vmatprep.subr.bf16.mxu0 %v1153_v0 }
  0x6f   : > { %856 = vmatmul.mubr.f32.vlgmr.msra.gmra.mrb[0].mxu1 %v1340_v20  ;;  %895 = vmatmul.mubr.f32.vlgmr.msra.gmra.mrb[0].mxu0 %v1340_v20 }
  0x70   : > { %924 = vmatpush3.bf16.msra.mxu1 %v923_v46  ;;  %942 = vmatpush3.bf16.msra.mxu0 %v1328_v13 }
  0x71   : > { %925 = vmatprep.subr.bf16.mxu1 %v1153_v0  ;;  %943 = vmatprep.subr.bf16.mxu0 %v1153_v0 }
  0x72   : > { %868 = vmatprep.mubr.msk.f32.mxu1 %vm1154_vm0, %v1155_v1  ;;  %907 = vmatprep.mubr.msk.f32.mxu0 %vm1154_vm0, %v1155_v1 }
  0x74   : > { %927 = vmatpush3.bf16.msra.mxu1 %v926_v47  ;;  %945 = vmatpush3.bf16.msra.mxu0 %v1334_v17 }
  0x75   : > { %866 = vmatprep.subr.mxu1 %v1155_v1  ;;  %905 = vmatprep.subr.mxu0 %v1155_v1 }
  0x78   : > { %867 = vmatpush3.msra.mxu1 %v298_v29  ;;  %906 = vmatpush3.msra.mxu0 %v201_v24 }
  0x79   : > { %869 = vmatmul.mubr.f32.vlgmr.msra.gmra.mrb[0].mxu1 %v259_v26  ;;  %908 = vmatmul.mubr.f32.vlgmr.msra.gmra.mrb[0].mxu0 %v1340_v20 }
 0x14c   : > { %v442_v48 = vpop.f32.mrb[0].mxu1  ;;  %v682_v49 = vpop.f32.mrb[0].mxu0 }
 0x14d   : > { %v946_v50 = vadd.f32 %v682_v49, %v442_v48  ;;  %v870_v51 = vpop.f32.mrb[1].mxu1  ;;  %v909_v52 = vpop.f32.mrb[1].mxu0 }
 0x14f   : > { %1017 = vtanh.f32 %v946_v50 }
 0x159   : > { %v1018_v53 = vpop.eup %1017 }
 0x15a   : > { %687 = vst [vmem:[%s173_s17] sm:$0xff] %v1018_v53 }
 0x15b   : > { %1090 = shalt.err (!%p1087_p7)
}
 0x15c   : > { %s1091_s6 = scalar_lea.hbm %s1389_s28, 128  ;;  %s1095_s24 = scalar_lea.hbm %s1435_s2, 256 }
 0x15d   : > { %p1092_p9 = scmp.ne.s32.totalorder %s1389_s28, %s1091_s6  ;;  %p1096_p0 = scmp.lt.u32.totalorder %s1389_s28, %s1435_s2 }
 0x15e   : > { %p1097_p11 = scmp.lt.u32.totalorder %s1095_s24, %s1091_s6  ;;  %p1099_p4 = scmp.lt.u32.totalorder %s1091_s6, %s1389_s28 }
 0x15f   : > { %p1093_p2 = pnand %p1092_p9, %p1263_p12 }
 0x160   : > { %p1098_p1 = por %p1097_p11, %p1096_p0 }
 0x161   : > { %p1094_p5 = pneg %p1093_p2 }
 0x162   : > { %p1100_p6 = por %p1099_p4, %p1098_p1 }
 0x164   : > { %p1101_p8 = pnand %p1100_p6, %p1094_p5 }
 0x166   : > { %1104 = shalt.err (!%p1101_p8)
}
 0x167   : > { %961 = dma.vmem_to_hbm [thread:$0]  (%p1263_p12), %s1391_s27, 128, %s1389_s28, %s689_s30  }
 0x168 PF: > { %s714_s26 = sand.u32 1, %s1135_s9   ;;  %p1450_p10 = scmp.ne.s32.totalorder %s1440_s16, 0 }
 0x169   : > { %p1451_p13 = scmp.ge.s32.totalorder %s1147_s12, 2  ;;  %s715_s19 = scalar_lea.sflag [#allocation4], %s714_s26 }
 0x16b   : > { %p972_p3 = pnand %p1451_p13, %p1450_p10 }
 0x16d   : > { %1130 = dma.done.wait (!%p972_p3), %s715_s19, 128  }
 0x16e   : > { %1132 = vsyncadd (!%p972_p3), %s715_s19, 4294967168  ;;  %p16_p7 = scmp.ge.s32.totalorder %s1228_s21, 4   ;;  %s1452_s9 = smov %s1139_s10 }
 0x16f   : > { %s1453_s10 = smov %s1143_s11  ;;  %s1454_s11 = smov %s1259_s8 }
 0x170   : > { %s1455_s12 = smov %s1228_s21  ;;  %18 = sbr.rel (!%p16_p7) target bundleno = 6 (0x6), region = 77 }
 0x177   :  { %720 = vsyncpa [#allocation3], 1 }
 0x178   :  { %722 = vsyncpa [#allocation3 + $0x1], 1 }
 0x179   :  { %723 = vsyncpa [#allocation6], 1 }
 0x17a   :  { %724 = vsyncpa [#allocation4], 1 }
 0x17b   :  { %726 = vsyncpa [#allocation4 + $0x1], 1 }

</bundles_post_ra>
